<compile_context>
chip_gen: v6e
topology: v6e:2x2x1
jax: 0.10.0
libtpu: 0.0.40
codegen_flags: <defaults>
</compile_context>

<pallas_src>
import functools

import numpy as np
import jax
import jax.numpy as jnp
from jax.experimental import pallas as pl
from jax.experimental.pallas import tpu as pltpu


# ----------------------------------------------------------------------------
# Fused (BN-shift + zero-pad mask + KxK conv as one im2col matmul) kernel.
# One grid step == one batch element.
# ----------------------------------------------------------------------------
def _bn_conv_kernel(x_ref, shift_ref, w_ref, b_ref, mask_ref, o_ref, patch_ref,
                    *, ksize, width):
    # x_ref:     (1, Cin, H*W)    channels on sublanes, pixels on lanes (lane-dense)
    # shift_ref: (Cin, 1)         per-channel (beta - mean*scale)/scale
    # w_ref:     (Cout, K*K*Cin)  conv weight with the BN scale folded in (tap-major)
    # b_ref:     (Cout, 1)        conv bias
    # mask_ref:  (K*K, H*W)       per-tap 0/1 validity (zero padding at borders)
    # o_ref:     (1, Cout, H*W)
    # patch_ref: (K*K*Cin, H*W)   VMEM scratch: im2col slab
    cin = x_ref.shape[1]
    hw = x_ref.shape[2]
    p = (ksize - 1) // 2

    # z = bn(x)/scale on valid pixels (scale already folded into w_ref).
    z = x_ref[0].astype(jnp.float32) + shift_ref[...]            # (Cin, H*W)
    masks = mask_ref[...]                                        # (K*K, H*W)

    # Re-zero the im2col scratch every step: positions never written below must be 0,
    # and re-zeroing each step stays correct under a megacore "parallel" grid split.
    patch_ref[...] = jnp.zeros((ksize * ksize * cin, hw), jnp.float32)

    for dy in range(ksize):
        for dx in range(ksize):
            t = dy * ksize + dx
            s = (dy - p) * width + (dx - p)      # flat pixel shift of this tap
            lo = max(0, -s)                      # output-pixel range with in-bounds src
            hi = min(hw, hw - s)
            patch_ref[t * cin:(t + 1) * cin, lo:hi] = (
                z[:, lo + s:hi + s] * masks[t:t + 1, lo:hi])

    acc = jnp.dot(w_ref[...], patch_ref[...],
                  preferred_element_type=jnp.float32)            # (Cout, H*W)
    acc = acc + b_ref[...]
    o_ref[0] = acc.astype(o_ref.dtype)


# ----------------------------------------------------------------------------
# Wrapper: BN batch statistics (fused jnp reductions), scale-fold, mask tables,
# and the pallas_call with lane-dense (N, Cout, H*W) output.
# ----------------------------------------------------------------------------
def contrastive_feature_transformer_forward(x_nchw, params, *, ksize, eps=1e-5):
    gamma = params["gamma"].astype(jnp.float32)
    beta = params["beta"].astype(jnp.float32)
    w_oihw = params["conv_w"].astype(jnp.float32)
    bias = params["conv_b"].astype(jnp.float32)

    n, cin, h, wd = x_nchw.shape
    cout = w_oihw.shape[0]
    hw = h * wd
    p = (ksize - 1) // 2

    # Free layout change: NCHW -> (N, Cin, H*W); pixels land on the TPU lane dim.
    x = x_nchw.astype(jnp.float32).reshape(n, cin, hw)

    # BatchNorm2d training-mode batch stats (biased variance, like PyTorch), as plain
    # jnp reductions -- XLA fuses them with the read of x; two-pass variance.
    mean = jnp.mean(x, axis=(0, 2))                                       # (Cin,)
    var = jnp.mean(jnp.square(x - mean[None, :, None]), axis=(0, 2))      # (Cin,)
    scale = gamma / jnp.sqrt(var + eps)                                   # (Cin,)

    # Fold BN scale into the conv weight; keep only the per-channel shift in-kernel.
    shift2 = (beta / scale - mean).reshape(cin, 1)                        # (Cin, 1)
    w_scaled = w_oihw * scale[None, :, None, None]                        # (O, I, K, K)
    w2 = jnp.transpose(w_scaled, (0, 2, 3, 1)).reshape(cout, ksize * ksize * cin)
    b2 = bias.reshape(cout, 1)

    # Static per-tap validity masks over flattened pixels (encode the zero padding).
    yy, xx = np.meshgrid(np.arange(h), np.arange(wd), indexing="ij")
    rows = []
    for dy in range(ksize):
        for dx in range(ksize):
            oy, ox = dy - p, dx - p
            valid = (yy + oy >= 0) & (yy + oy < h) & (xx + ox >= 0) & (xx + ox < wd)
            rows.append(valid.reshape(-1))
    mask_arr = jnp.asarray(np.stack(rows, axis=0).astype(np.float32))     # (K*K, H*W)

    kern = functools.partial(_bn_conv_kernel, ksize=ksize, width=wd)
    # TODO(synk): for large activations, feed x/weights as bf16 (HBM-bound path) and
    # add an H-tile grid axis (K-1 row halo) sized to the per-generation VMEM budget.
    out = pl.pallas_call(
        kern,
        out_shape=jax.ShapeDtypeStruct((n, cout, hw), jnp.float32),
        grid=(n,),
        in_specs=[
            pl.BlockSpec((1, cin, hw), lambda b: (b, 0, 0)),
            pl.BlockSpec((cin, 1), lambda b: (0, 0)),
            pl.BlockSpec((cout, ksize * ksize * cin), lambda b: (0, 0)),
            pl.BlockSpec((cout, 1), lambda b: (0, 0)),
            pl.BlockSpec((ksize * ksize, hw), lambda b: (0, 0)),
        ],
        out_specs=pl.BlockSpec((1, cout, hw), lambda b: (b, 0, 0)),
        scratch_shapes=[pltpu.VMEM((ksize * ksize * cin, hw), jnp.float32)],
        compiler_params=pltpu.CompilerParams(dimension_semantics=("parallel",)),
    )(x, shift2, w2, b2, mask_arr)

    return out.reshape(n, cout, h, wd)          # free reshape back to NCHW


# ----------------------------------------------------------------------------
# Pure-JAX reference (for correctness check)
# ----------------------------------------------------------------------------
def reference_forward(x_nchw, params, *, ksize, eps=1e-5):
    gamma = params["gamma"].reshape(1, -1, 1, 1)
    beta = params["beta"].reshape(1, -1, 1, 1)
    x = x_nchw.astype(jnp.float32)
    mean = x.mean(axis=(0, 2, 3), keepdims=True)
    var = ((x - mean) ** 2).mean(axis=(0, 2, 3), keepdims=True)   # biased, like BN
    xbn = (x - mean) / jnp.sqrt(var + eps) * gamma + beta
    p = (ksize - 1) // 2
    out = jax.lax.conv_general_dilated(
        xbn, params["conv_w"].astype(jnp.float32),
        window_strides=(1, 1), padding=((p, p), (p, p)),
        dimension_numbers=("NCHW", "OIHW", "NCHW"))
    return out + params["conv_b"].reshape(1, -1, 1, 1)


if __name__ == "__main__":
    # Small shapes consistent with the module: batch=2, in_channels=4, 16x16 spatial,
    # config_model.out_channels=8, config_model.kernel_size=3.
    N, CIN, H, W = 2, 4, 16, 16
    COUT, KSIZE = 8, 3

    key = jax.random.PRNGKey(0)
    k_x, k_w, k_b, k_g, k_be = jax.random.split(key, 5)
    x = jax.random.normal(k_x, (N, CIN, H, W), jnp.float32)
    params = dict(
        conv_w=0.1 * jax.random.normal(k_w, (COUT, CIN, KSIZE, KSIZE), jnp.float32),
        conv_b=0.1 * jax.random.normal(k_b, (COUT,), jnp.float32),
        gamma=1.0 + 0.1 * jax.random.normal(k_g, (CIN,), jnp.float32),
        beta=0.1 * jax.random.normal(k_be, (CIN,), jnp.float32),
    )
    # NOTE: self.linear (1x1 conv) and prepend_relu / append_normalize are defined in
    # __init__ but NOT used in forward(), so they are intentionally not applied here.
    # TODO(synk): the `fit` training loop / optimizer / loss helpers are out of scope
    # of the forward-pass kernel.

    fwd = jax.jit(functools.partial(contrastive_feature_transformer_forward,
                                    ksize=KSIZE))
    out = jax.block_until_ready(fwd(x, params))
    ref = reference_forward(x, params, ksize=KSIZE)

    assert out.shape == (N, COUT, H, W), out.shape
    assert jnp.allclose(out, ref, atol=2e-4, rtol=2e-4), \
        float(jnp.max(jnp.abs(out - ref)))
    print("KERNEL_OK")
</pallas_src>

<mosaic_0001>
module attributes {stable_mosaic.version = 11 : i64} {
  func.func @_bn_conv_kernel(%arg0: i32, %arg1: memref<1x4x256xf32, #tpu.memory_space<vmem>>, %arg2: memref<4x1xf32, #tpu.memory_space<vmem>>, %arg3: memref<8x36xf32, #tpu.memory_space<vmem>>, %arg4: memref<8x1xf32, #tpu.memory_space<vmem>>, %arg5: memref<9x256xf32, #tpu.memory_space<vmem>>, %arg6: memref<1x8x256xf32, #tpu.memory_space<vmem>>, %arg7: memref<36x256xf32, #tpu.memory_space<vmem>>) attributes {dimension_semantics = [#tpu.dimension_semantics<parallel>], iteration_bounds = array<i64: 2>, scalar_prefetch = 0 : i64, scratch_operands = 1 : i64, tpu.core_type = #tpu.core_type<tc>, window_params = [{transform_indices = @transform_0, window_bounds = array<i64: 1, 4, 256>}, {pipeline_mode = #tpu.pipeline_mode<synchronous>, transform_indices = @transform_1, window_bounds = array<i64: 4, 1>}, {pipeline_mode = #tpu.pipeline_mode<synchronous>, transform_indices = @transform_2, window_bounds = array<i64: 8, 36>}, {pipeline_mode = #tpu.pipeline_mode<synchronous>, transform_indices = @transform_3, window_bounds = array<i64: 8, 1>}, {pipeline_mode = #tpu.pipeline_mode<synchronous>, transform_indices = @transform_4, window_bounds = array<i64: 9, 256>}, {transform_indices = @transform_5, window_bounds = array<i64: 1, 8, 256>}]} {
    %c0 = arith.constant 0 : index
    %c0_0 = arith.constant 0 : index
    %c0_1 = arith.constant 0 : index
    %0 = vector.load %arg1[%c0, %c0_0, %c0_1] : memref<1x4x256xf32, #tpu.memory_space<vmem>>, vector<1x4x256xf32>
    %1 = vector.shape_cast %0 : vector<1x4x256xf32> to vector<4x256xf32>
    %c0_2 = arith.constant 0 : index
    %c0_3 = arith.constant 0 : index
    %2 = vector.load %arg2[%c0_2, %c0_3] : memref<4x1xf32, #tpu.memory_space<vmem>>, vector<4x1xf32>
    %3 = vector.broadcast %2 : vector<4x1xf32> to vector<4x256xf32>
    %4 = arith.addf %1, %3 : vector<4x256xf32>
    %c0_4 = arith.constant 0 : index
    %c0_5 = arith.constant 0 : index
    %5 = vector.load %arg5[%c0_4, %c0_5] : memref<9x256xf32, #tpu.memory_space<vmem>>, vector<9x256xf32>
    %cst = arith.constant 0.000000e+00 : f32
    %6 = vector.broadcast %cst : f32 to vector<36x256xf32>
    %c0_6 = arith.constant 0 : index
    %c0_7 = arith.constant 0 : index
    %7 = vector.load %arg7[%c0_6, %c0_7] : memref<36x256xf32, #tpu.memory_space<vmem>>, vector<36x256xf32>
    tpu.vector_store %arg7[%c0_6, %c0_7], %6 {strides = array<i32>} : memref<36x256xf32, #tpu.memory_space<vmem>>, vector<36x256xf32>,
    %8 = vector.extract_strided_slice %4 {offsets = [0, 0], sizes = [4, 239], strides = [1, 1]} : vector<4x256xf32> to vector<4x239xf32>
    %9 = vector.extract_strided_slice %5 {offsets = [0, 17], sizes = [1, 239], strides = [1, 1]} : vector<9x256xf32> to vector<1x239xf32>
    %10 = vector.broadcast %9 : vector<1x239xf32> to vector<4x239xf32>
    %11 = arith.mulf %8, %10 : vector<4x239xf32>
    %c0_8 = arith.constant 0 : index
    %c17 = arith.constant 17 : index
    %12 = vector.load %arg7[%c0_8, %c17] : memref<36x256xf32, #tpu.memory_space<vmem>>, vector<4x239xf32>
    tpu.vector_store %arg7[%c0_8, %c17], %11 {strides = array<i32>} : memref<36x256xf32, #tpu.memory_space<vmem>>, vector<4x239xf32>,
    %13 = vector.extract_strided_slice %4 {offsets = [0, 0], sizes = [4, 240], strides = [1, 1]} : vector<4x256xf32> to vector<4x240xf32>
    %14 = vector.extract_strided_slice %5 {offsets = [1, 16], sizes = [1, 240], strides = [1, 1]} : vector<9x256xf32> to vector<1x240xf32>
    %15 = vector.broadcast %14 : vector<1x240xf32> to vector<4x240xf32>
    %16 = arith.mulf %13, %15 : vector<4x240xf32>
    %c4 = arith.constant 4 : index
    %c16 = arith.constant 16 : index
    %17 = vector.load %arg7[%c4, %c16] : memref<36x256xf32, #tpu.memory_space<vmem>>, vector<4x240xf32>
    tpu.vector_store %arg7[%c4, %c16], %16 {strides = array<i32>} : memref<36x256xf32, #tpu.memory_space<vmem>>, vector<4x240xf32>,
    %18 = vector.extract_strided_slice %4 {offsets = [0, 0], sizes = [4, 241], strides = [1, 1]} : vector<4x256xf32> to vector<4x241xf32>
    %19 = vector.extract_strided_slice %5 {offsets = [2, 15], sizes = [1, 241], strides = [1, 1]} : vector<9x256xf32> to vector<1x241xf32>
    %20 = vector.broadcast %19 : vector<1x241xf32> to vector<4x241xf32>
    %21 = arith.mulf %18, %20 : vector<4x241xf32>
    %c8 = arith.constant 8 : index
    %c15 = arith.constant 15 : index
    %22 = vector.load %arg7[%c8, %c15] : memref<36x256xf32, #tpu.memory_space<vmem>>, vector<4x241xf32>
    tpu.vector_store %arg7[%c8, %c15], %21 {strides = array<i32>} : memref<36x256xf32, #tpu.memory_space<vmem>>, vector<4x241xf32>,
    %23 = vector.extract_strided_slice %4 {offsets = [0, 0], sizes = [4, 255], strides = [1, 1]} : vector<4x256xf32> to vector<4x255xf32>
    %24 = vector.extract_strided_slice %5 {offsets = [3, 1], sizes = [1, 255], strides = [1, 1]} : vector<9x256xf32> to vector<1x255xf32>
    %25 = vector.broadcast %24 : vector<1x255xf32> to vector<4x255xf32>
    %26 = arith.mulf %23, %25 : vector<4x255xf32>
    %c12 = arith.constant 12 : index
    %c1 = arith.constant 1 : index
    %27 = vector.load %arg7[%c12, %c1] : memref<36x256xf32, #tpu.memory_space<vmem>>, vector<4x255xf32>
    tpu.vector_store %arg7[%c12, %c1], %26 {strides = array<i32>} : memref<36x256xf32, #tpu.memory_space<vmem>>, vector<4x255xf32>,
    %28 = vector.extract_strided_slice %5 {offsets = [4, 0], sizes = [1, 256], strides = [1, 1]} : vector<9x256xf32> to vector<1x256xf32>
    %29 = vector.broadcast %28 : vector<1x256xf32> to vector<4x256xf32>
    %30 = arith.mulf %4, %29 : vector<4x256xf32>
    %c16_9 = arith.constant 16 : index
    %c0_10 = arith.constant 0 : index
    %31 = vector.load %arg7[%c16_9, %c0_10] : memref<36x256xf32, #tpu.memory_space<vmem>>, vector<4x256xf32>
    tpu.vector_store %arg7[%c16_9, %c0_10], %30 {strides = array<i32>} : memref<36x256xf32, #tpu.memory_space<vmem>>, vector<4x256xf32>,
    %32 = vector.extract_strided_slice %4 {offsets = [0, 1], sizes = [4, 255], strides = [1, 1]} : vector<4x256xf32> to vector<4x255xf32>
    %33 = vector.extract_strided_slice %5 {offsets = [5, 0], sizes = [1, 255], strides = [1, 1]} : vector<9x256xf32> to vector<1x255xf32>
    %34 = vector.broadcast %33 : vector<1x255xf32> to vector<4x255xf32>
    %35 = arith.mulf %32, %34 : vector<4x255xf32>
    %c20 = arith.constant 20 : index
    %c0_11 = arith.constant 0 : index
    %36 = vector.load %arg7[%c20, %c0_11] : memref<36x256xf32, #tpu.memory_space<vmem>>, vector<4x255xf32>
    tpu.vector_store %arg7[%c20, %c0_11], %35 {strides = array<i32>} : memref<36x256xf32, #tpu.memory_space<vmem>>, vector<4x255xf32>,
    %37 = vector.extract_strided_slice %4 {offsets = [0, 15], sizes = [4, 241], strides = [1, 1]} : vector<4x256xf32> to vector<4x241xf32>
    %38 = vector.extract_strided_slice %5 {offsets = [6, 0], sizes = [1, 241], strides = [1, 1]} : vector<9x256xf32> to vector<1x241xf32>
    %39 = vector.broadcast %38 : vector<1x241xf32> to vector<4x241xf32>
    %40 = arith.mulf %37, %39 : vector<4x241xf32>
    %c24 = arith.constant 24 : index
    %c0_12 = arith.constant 0 : index
    %41 = vector.load %arg7[%c24, %c0_12] : memref<36x256xf32, #tpu.memory_space<vmem>>, vector<4x241xf32>
    tpu.vector_store %arg7[%c24, %c0_12], %40 {strides = array<i32>} : memref<36x256xf32, #tpu.memory_space<vmem>>, vector<4x241xf32>,
    %42 = vector.extract_strided_slice %4 {offsets = [0, 16], sizes = [4, 240], strides = [1, 1]} : vector<4x256xf32> to vector<4x240xf32>
    %43 = vector.extract_strided_slice %5 {offsets = [7, 0], sizes = [1, 240], strides = [1, 1]} : vector<9x256xf32> to vector<1x240xf32>
    %44 = vector.broadcast %43 : vector<1x240xf32> to vector<4x240xf32>
    %45 = arith.mulf %42, %44 : vector<4x240xf32>
    %c28 = arith.constant 28 : index
    %c0_13 = arith.constant 0 : index
    %46 = vector.load %arg7[%c28, %c0_13] : memref<36x256xf32, #tpu.memory_space<vmem>>, vector<4x240xf32>
    tpu.vector_store %arg7[%c28, %c0_13], %45 {strides = array<i32>} : memref<36x256xf32, #tpu.memory_space<vmem>>, vector<4x240xf32>,
    %47 = vector.extract_strided_slice %4 {offsets = [0, 17], sizes = [4, 239], strides = [1, 1]} : vector<4x256xf32> to vector<4x239xf32>
    %48 = vector.extract_strided_slice %5 {offsets = [8, 0], sizes = [1, 239], strides = [1, 1]} : vector<9x256xf32> to vector<1x239xf32>
    %49 = vector.broadcast %48 : vector<1x239xf32> to vector<4x239xf32>
    %50 = arith.mulf %47, %49 : vector<4x239xf32>
    %c32 = arith.constant 32 : index
    %c0_14 = arith.constant 0 : index
    %51 = vector.load %arg7[%c32, %c0_14] : memref<36x256xf32, #tpu.memory_space<vmem>>, vector<4x239xf32>
    tpu.vector_store %arg7[%c32, %c0_14], %50 {strides = array<i32>} : memref<36x256xf32, #tpu.memory_space<vmem>>, vector<4x239xf32>,
    %c0_15 = arith.constant 0 : index
    %c0_16 = arith.constant 0 : index
    %52 = vector.load %arg3[%c0_15, %c0_16] : memref<8x36xf32, #tpu.memory_space<vmem>>, vector<8x36xf32>
    %c0_17 = arith.constant 0 : index
    %c0_18 = arith.constant 0 : index
    %53 = vector.load %arg7[%c0_17, %c0_18] : memref<36x256xf32, #tpu.memory_space<vmem>>, vector<36x256xf32>
    %cst_19 = arith.constant dense<0.000000e+00> : vector<8x256xf32>
    %54 = tpu.matmul %52, %53, %cst_19 {dimension_numbers = #tpu.dot_dimension_numbers<[1], [0], [0], [1], [0, 0, 1, 1], [], []>} : vector<8x36xf32>, vector<36x256xf32>, vector<8x256xf32> -> vector<8x256xf32>
    %c0_20 = arith.constant 0 : index
    %c0_21 = arith.constant 0 : index
    %55 = vector.load %arg4[%c0_20, %c0_21] : memref<8x1xf32, #tpu.memory_space<vmem>>, vector<8x1xf32>
    %56 = vector.broadcast %55 : vector<8x1xf32> to vector<8x256xf32>
    %57 = arith.addf %54, %56 : vector<8x256xf32>
    %c0_22 = arith.constant 0 : index
    %c0_23 = arith.constant 0 : index
    %c0_24 = arith.constant 0 : index
    %58 = vector.load %arg6[%c0_22, %c0_23, %c0_24] : memref<1x8x256xf32, #tpu.memory_space<vmem>>, vector<1x8x256xf32>
    %59 = vector.shape_cast %58 : vector<1x8x256xf32> to vector<8x256xf32>
    %60 = vector.shape_cast %57 : vector<8x256xf32> to vector<1x8x256xf32>
    tpu.vector_store %arg6[%c0_22, %c0_23, %c0_24], %60 {strides = array<i32>} : memref<1x8x256xf32, #tpu.memory_space<vmem>>, vector<1x8x256xf32>,
    return
  }
  func.func @transform_0(%arg0: i32) -> (i32, i32, i32) {
    %c0_i32 = arith.constant 0 : i32
    %c0_i32_0 = arith.constant 0 : i32
    %c0_i32_1 = arith.constant 0 : i32
    return %arg0, %c0_i32, %c0_i32_0 : i32, i32, i32
  }
  func.func @transform_1(%arg0: i32) -> (i32, i32) {
    %c0_i32 = arith.constant 0 : i32
    %c0_i32_0 = arith.constant 0 : i32
    %c0_i32_1 = arith.constant 0 : i32
    return %c0_i32, %c0_i32_0 : i32, i32
  }
  func.func @transform_2(%arg0: i32) -> (i32, i32) {
    %c0_i32 = arith.constant 0 : i32
    %c0_i32_0 = arith.constant 0 : i32
    %c0_i32_1 = arith.constant 0 : i32
    return %c0_i32, %c0_i32_0 : i32, i32
  }
  func.func @transform_3(%arg0: i32) -> (i32, i32) {
    %c0_i32 = arith.constant 0 : i32
    %c0_i32_0 = arith.constant 0 : i32
    %c0_i32_1 = arith.constant 0 : i32
    return %c0_i32, %c0_i32_0 : i32, i32
  }
  func.func @transform_4(%arg0: i32) -> (i32, i32) {
    %c0_i32 = arith.constant 0 : i32
    %c0_i32_0 = arith.constant 0 : i32
    %c0_i32_1 = arith.constant 0 : i32
    return %c0_i32, %c0_i32_0 : i32, i32
  }
  func.func @transform_5(%arg0: i32) -> (i32, i32, i32) {
    %c0_i32 = arith.constant 0 : i32
    %c0_i32_0 = arith.constant 0 : i32
    %c0_i32_1 = arith.constant 0 : i32
    return %arg0, %c0_i32, %c0_i32_0 : i32, i32, i32
  }
}

</mosaic_0001>

<bundles_post_ra>
// kernel: contrastive_feature_transformer_forward.1
= control target key start
LH: loop header
LB: loop body
LE: loop exit
PB: predicated region body
PF: predicated region fallthrough
CT: control target
= control target key end

     0   :  { %s756_s18 = smov 0   ;;  %s853_s0 = inlined_call_operand.vmem [shape: f32[2,4,256], index: 0, kind: input, shape index: {}]   ;;  %s854_s1 = inlined_call_operand.vmem [shape: f32[4,1], index: 1, kind: input, shape index: {}]   ;;  %s855_s2 = inlined_call_operand.vmem [shape: f32[8,36], index: 2, kind: input, shape index: {}]   ;;  %s856_s3 = inlined_call_operand.vmem [shape: f32[8,1], index: 3, kind: input, shape index: {}]   ;;  %s857_s4 = inlined_call_operand.vmem [shape: f32[9,256], index: 4, kind: input, shape index: {}]   ;;  %s858_s5 = inlined_call_operand.vmem [shape: f32[2,8,256], index: 5, kind: output, shape index: {}]  }
   0x1 LB: > { %s668_s19 = sadd.s32 4294967295, %s713_s18   ;;  %p672_p0 = scmp.ge.s32.totalorder %s713_s18, 1  ;;  %s713_s18 = sphi %s756_s18, %s15_s18  }
   0x2   : > { %p187_p1 = scmp.lt.s32.totalorder %s713_s18, 3 }
   0x4   : > { %p188_p2 = pnand %p672_p0, %p187_p1 }
   0x5   : > { %s717_s30 = smov (!%p188_p2), 17   ;;  %s718_s6 = smov (!%p188_p2), 15  }
   0x6   : > { %191 = sbr.rel (%p188_p2) target bundleno = 498 (0x1f2), region = 40  ;;  %s719_s7 = smov (!%p188_p2), 1  }
   0x7   : > { %s720_s8 = smov (!%p188_p2), 16   ;;  %s721_s9 = smov (!%p188_p2), 127  }
   0x8   : > { %s722_s10 = smov (!%p188_p2), 113   ;;  %s723_s11 = smov (!%p188_p2), 112  }
   0x9   : > { %s724_s12 = smov (!%p188_p2), 111   ;;  %p215_p3 = scmp.lt.s32.totalorder (!%p188_p2), %s668_s19, 1 }
   0xb   : > { %v226_v0 = vld [vmem:[%s854_s1] sm:$0xf]  ;;  %v234_v1 = vlaneseq  ;;  %v715_v2 = vmov 0   ;;  %v677_v3 = vld [vmem:[%s857_s4 + $0x10] ss:$0 sm:$0xff]  ;;  %v241_v8 = vld [vmem:[%s857_s4 + $0x8] sm:$0xff] }
   0xc   : > { %705 = vset.pattern.permute.xlu0 %v715_v2  ;;  %v678_v4 = vld [vmem:[%s857_s4 + $0x18] ss:$0 sm:$0xff]  ;;  %706 = vset.pattern.permute.xlu1 %v715_v2  ;;  %v240_v7 = vld [vmem:[%s857_s4] sm:$0xff]  ;;  %v716_v12 = vmov 0.0   ;;  %v725_v42 = vmov 839922192  }
   0xd   : > { %229 = vperm.xlu0 %705, %v226_v0   ;;  %v773_v5 = vshrl.u32 %v234_v1, 7  ;;  %v493_v6 = vcombine.low %v677_v3, %v678_v4  ;;  %251 = vst [vmem:[#allocation2 + $0x38] sm:$0xff] %v716_v12  ;;  %244 = vst [vmem:[#allocation2] sm:$0xff] %v716_v12  ;;  %604 = vmatprep.mubr.f32.mxu0 %v716_v12  ;;  %v232_v43 = vunpack.c.l.s4 %v725_v42  ;;  %s860_s19 = smov (!%p215_p3, %s668_s19), 1  ;;  %vm309_vm0 = vcmask 130048  }
   0xe   : > { %245 = vst [vmem:[#allocation2 + $0x8] sm:$0xff] %v716_v12  ;;  %246 = vst [vmem:[#allocation2 + $0x10] sm:$0xff] %v716_v12  ;;  %s684_s13 = sshll.u32 %s860_s19, 3  ;;  %vm278_vm1 = vcmask 138240   ;;  %vm340_vm2 = vcmask 121856   ;;  %vm371_vm3 = vcmask 7168  }
   0xf   : > { %v427_v9 = vsub.s32 6, %v773_v5  ;;  %v456_v10 = vsub.s32 7, %v773_v5  ;;  %v398_v11 = vsub.s32 5, %v773_v5  ;;  %247 = vst [vmem:[#allocation2 + $0x18] sm:$0xff] %v716_v12  ;;  %248 = vst [vmem:[#allocation2 + $0x20] sm:$0xff] %v716_v12  ;;  %v318_v13 = vsub.s32 2, %v773_v5  ;;  %s219_s16 = scalar_lea.vmem %s853_s0, %s684_s13 }
  0x10   : > { %249 = vst [vmem:[#allocation2 + $0x28] sm:$0xff] %v716_v12  ;;  %250 = vst [vmem:[#allocation2 + $0x30] sm:$0xff] %v716_v12  ;;  %v349_v14 = vsub.s32 3, %v773_v5  ;;  %v287_v21 = vsub.s32 1, %v773_v5  ;;  %v256_v24 = vsub.s32 0, %v773_v5  ;;  %v380_v33 = vsub.s32 4, %v773_v5 }
  0x11   : > { %252 = vst [vmem:[#allocation2 + $0x40] sm:$0xf] %v716_v12  ;;  %253 = vst [vmem:[#allocation2 + $0x48] sm:$0xf] %v716_v12  ;;  %v428_v15 = vrot.slane %v240_v7, %v427_v9  ;;  %v432_v16 = vrot.slane %v241_v8, %v427_v9  ;;  %v457_v17 = vrot.slane %v240_v7, %v456_v10  ;;  %494 = vrot.lane.b32.xlu0 %v493_v6, %s717_s30  ;;  %v225_v48 = vld [vmem:[%s219_s16] sm:$0xff]  ;;  %vm330_vm4 = vcmask 924672  }
  0x12   : > { %v461_v18 = vrot.slane %v241_v8, %v456_v10  ;;  %v399_v19 = vrot.slane %v240_v7, %v398_v11  ;;  %v403_v20 = vrot.slane %v241_v8, %v398_v11  ;;  %v350_v25 = vrot.slane %v240_v7, %v349_v14  ;;  %s685_s23 = sshll.u32 %s860_s19, 4 }
  0x13   : > { %v435_v22 = vcombine.low %v428_v15, %v432_v16  ;;  %v354_v26 = vrot.slane %v241_v8, %v349_v14  ;;  %v319_v28 = vrot.slane %v240_v7, %v318_v13  ;;  %v323_v29 = vrot.slane %v241_v8, %v318_v13  ;;  %s224_s26 = scalar_lea.vmem %s858_s5, %s685_s23 }
  0x14   : > { %v406_v23 = vcombine.low %v399_v19, %v403_v20  ;;  %v464_v27 = vcombine.low %v457_v17, %v461_v18  ;;  %v288_v31 = vrot.slane %v240_v7, %v287_v21  ;;  %v292_v32 = vrot.slane %v241_v8, %v287_v21 }
  0x15   : > { %436 = vrot.lane.b32.xlu1 %v435_v22, %s718_s6  ;;  %v357_v30 = vcombine.low %v350_v25, %v354_v26  ;;  %v257_v34 = vrot.slane %v240_v7, %v256_v24  ;;  %v326_v35 = vcombine.low %v319_v28, %v323_v29  ;;  %v261_v36 = vrot.slane %v241_v8, %v256_v24  ;;  %v523_v28 = vld [vmem:[%s856_s3] sm:$0xff] }
  0x16   : > { %407 = vrot.lane.b32.xlu0 %v406_v23, %s719_s7  ;;  %v381_v37 = vrot.slane %v240_v7, %v380_v33  ;;  %v385_v38 = vrot.slane %v241_v8, %v380_v33  ;;  %v295_v39 = vcombine.low %v288_v31, %v292_v32  ;;  %v233_v44 = vunpack.c.0.s8 %v232_v43 }
  0x17   : > { %v264_v41 = vcombine.low %v257_v34, %v261_v36  ;;  %vm361_vm5 = vcmask 1039360   ;;  %vm268_vm6 = vcmask 908288   ;;  %vm299_vm7 = vcmask 916480  }
  0x18   : > { %v388_v40 = vcombine.low %v381_v37, %v385_v38  ;;  %v236_v45 = vsub.s32 %v233_v44, %v773_v5  ;;  %vm481_vm8 = vcmask 916484   ;;  %vm423_vm9 = vcmask 1039364  }
  0x19   : > { %465 = vrot.lane.b32.xlu1 %v464_v27, %s720_s8  ;;  %vm344_vm10 = vcmask 1043576   ;;  %vm510_vm11 = vcmask 904192   ;;  %vm282_vm12 = vcmask 1043592   ;;  %vm452_vm13 = vcmask 920576  }
  0x1a   : > { %358 = vrot.lane.b32.xlu0 %v357_v30, %s721_s9  ;;  %vm533_vm14 = vcmask 1043456   ;;  %vm375_vm15 = vcmask 1047564  }
  0x1d   : > { %327 = vrot.lane.b32.xlu1 %v326_v35, %s722_s10 }
  0x1e   : > { %296 = vrot.lane.b32.xlu0 %v295_v39, %s723_s11 }
  0x21   : > { %265 = vrot.lane.b32.xlu1 %v264_v41, %s724_s12 }
  0x87   : > { %v437_v46 = vpop.permute.xlu1 %436 }
  0x88   : > { %v230_v47 = vpop.permute.xlu0 %229  ;;  %v438_v57 = vrot.slane %v437_v46, 4 }
  0x89   : > { %v237_v49 = vrot.slane %v230_v47, %v236_v45 }
  0x8a   : > { %v439_v2 = vsel %vm340_vm2, %v438_v57, %v437_v46 }
  0x8b   : > { %v239_v50 = vadd.f32 %v237_v49, %v225_v48  ;;  %v466_v51 = vpop.permute.xlu1 %465 }
  0x8c   : > { %v467_v52 = vrot.slane %v466_v51, 4  ;;  %v495_v53 = vpop.permute.xlu0 %494 }
  0x8d   : > { %v496_v54 = vrot.slane %v495_v53, 4  ;;  %v390_v55 = vmul.f32 %v388_v40, %v239_v50  ;;  %v441_v7 = vmul.f32 %v439_v2, %v239_v50 }
  0x8e   : > { %v468_v56 = vsel %vm309_vm0, %v467_v52, %v466_v51 }
  0x8f   : > { %v470_v58 = vmul.f32 %v468_v56, %v239_v50  ;;  %v497_v59 = vsel %vm278_vm1, %v496_v54, %v495_v53  ;;  %v328_v60 = vpop.permute.xlu1 %327  ;;  %v392_v61 = vcombine.high %v390_v55, %v390_v55  ;;  %394 = vst [vmem:[#allocation2 + $0x20] sm:$0xf] %v390_v55  ;;  %v443_v18 = vcombine.high %v441_v7, %v441_v7 }
  0x90   : > { %v499_v62 = vmul.f32 %v497_v59, %v239_v50  ;;  %v408_v63 = vpop.permute.xlu0 %407  ;;  %v329_v0 = vrot.slane %v328_v60, 4 }
  0x91   : > { %v409_v1 = vrot.slane %v408_v63, 4  ;;  %475 = vrot.lane.b32.xlu0 %v470_v58, %s723_s11  ;;  %395 = vst [vmem:[#allocation2 + $0x28] sm:$0xf] %v392_v61  ;;  %v472_v19 = vcombine.low %v470_v58, %v470_v58 }
  0x92   : > { %502 = vrot.lane.b32.xlu1 %v499_v62, %s724_s12  ;;  %v331_v8 = vsel %vm330_vm4, %v328_v60, %v329_v0  ;;  %v501_v16 = vcombine.high %v499_v62, %v499_v62  ;;  %v512_v62 = vld [vmem:[%s855_s2] sm:$0xff] }
  0x93   : > { %v410_v3 = vsel %vm371_vm3, %v409_v1, %v408_v63  ;;  %v266_v4 = vpop.permute.xlu1 %265  ;;  %v333_v12 = vmul.f32 %v331_v8, %v239_v50 }
  0x94   : > { %v412_v5 = vmul.f32 %v410_v3, %v239_v50  ;;  %v359_v6 = vpop.permute.xlu0 %358  ;;  %v267_v9 = vrot.slane %v266_v4, 4 }
  0x95   : > { %v360_v10 = vrot.slane %v359_v6, 4  ;;  %v335_v21 = vcombine.high %v333_v12, %v333_v12 }
  0x96   : > { %444 = vrot.lane.b32.xlu1 %v441_v7, %s722_s10  ;;  %417 = vrot.lane.b32.xlu0 %v412_v5, %s721_s9  ;;  %v269_v14 = vsel %vm268_vm6, %v266_v4, %v267_v9  ;;  %v414_v22 = vcombine.low %v412_v5, %v412_v5 }
  0x97   : > { %v362_v11 = vsel %vm361_vm5, %v359_v6, %v360_v10  ;;  %v271_v15 = vmul.f32 %v269_v14, %v239_v50 }
  0x98   : > { %v364_v13 = vmul.f32 %v362_v11, %v239_v50  ;;  %v297_v17 = vpop.permute.xlu0 %296 }
  0x99   : > { %v298_v20 = vrot.slane %v297_v17, 4  ;;  %v273_v26 = vcombine.high %v271_v15, %v271_v15 }
  0x9a   : > { %369 = vrot.lane.b32.xlu0 %v364_v13, %s719_s7  ;;  %336 = vrot.lane.b32.xlu1 %v333_v12, %s718_s6  ;;  %v366_v25 = vcombine.low %v364_v13, %v364_v13 }
  0x9b   : > { %v300_v23 = vsel %vm299_vm7, %v297_v17, %v298_v20 }
  0x9c   : > { %v302_v24 = vmul.f32 %v300_v23, %v239_v50 }
  0x9e   : > { %504 = vrot.lane.b32.xlu0 %v501_v16, %s724_s12  ;;  %274 = vrot.lane.b32.xlu1 %v271_v15, %s717_s30  ;;  %v304_v27 = vcombine.low %v302_v24, %v302_v24 }
  0xa2   : > { %446 = vrot.lane.b32.xlu0 %v443_v18, %s722_s10  ;;  %473 = vrot.lane.b32.xlu1 %v472_v19, %s723_s11 }
  0xa6   : > { %338 = vrot.lane.b32.xlu0 %v335_v21, %s718_s6  ;;  %415 = vrot.lane.b32.xlu1 %v414_v22, %s721_s9 }
  0xaa   : > { %367 = vrot.lane.b32.xlu1 %v366_v25, %s719_s7  ;;  %276 = vrot.lane.b32.xlu0 %v273_v26, %s717_s30 }
  0xae   : > { %305 = vrot.lane.b32.xlu1 %v304_v27, %s720_s8  ;;  %307 = vrot.lane.b32.xlu0 %v302_v24, %s720_s8 }
  0xb2   : > { %526 = vperm.xlu1 %706, %v523_v28  }
 0x103   : > { %v476_v29 = vpop.permute.xlu0 %475 }
 0x104   : > { %482 = vst.msk [vmem:[#allocation2 + $0x38] sm:$0xf0] %vm481_vm8, %v476_v29  ;;  %v503_v30 = vpop.permute.xlu1 %502 }
 0x108   : > { %v445_v31 = vpop.permute.xlu1 %444  ;;  %v418_v32 = vpop.permute.xlu0 %417 }
 0x109   : > { %424 = vst.msk [vmem:[#allocation2 + $0x28] sm:$0xf0] %vm423_vm9, %v418_v32 }
 0x10c   : > { %v370_v33 = vpop.permute.xlu0 %369  ;;  %v337_v34 = vpop.permute.xlu1 %336 }
 0x10d   : > { %345 = vst.msk [vmem:[#allocation2 + $0x10] sm:$0xf] %vm344_vm10, %v337_v34 }
 0x110   : > { %v505_v35 = vpop.permute.xlu0 %504  ;;  %v275_v36 = vpop.permute.xlu1 %274  ;;  %v518_v54 = vld [vmem:[#allocation2 + $0x28] sm:$0xff] }
 0x111   : > { %v506_v37 = vsel %vm268_vm6, %v503_v30, %v505_v35  ;;  %511 = vst.msk [vmem:[#allocation2 + $0x48] sm:$0xf] %vm510_vm11, %v505_v35 }
 0x112   : > { %283 = vst.msk [vmem:[#allocation2] sm:$0xf] %vm282_vm12, %v275_v36  ;;  %509 = vst [vmem:[#allocation2 + $0x40] sm:$0xf] %v506_v37 }
 0x114   : > { %v447_v38 = vpop.permute.xlu0 %446  ;;  %v474_v39 = vpop.permute.xlu1 %473 }
 0x115   : > { %v448_v40 = vsel %vm330_vm4, %v445_v31, %v447_v38  ;;  %453 = vst.msk [vmem:[#allocation2 + $0x38] sm:$0xf] %vm452_vm13, %v447_v38  ;;  %v477_v41 = vsel %vm299_vm7, %v474_v39, %v476_v29 }
 0x116   : > { %451 = vst [vmem:[#allocation2 + $0x30] sm:$0xf] %v448_v40  ;;  %480 = vst [vmem:[#allocation2 + $0x30] sm:$0xf0] %v477_v41 }
 0x118   : > { %v339_v42 = vpop.permute.xlu0 %338  ;;  %v416_v43 = vpop.permute.xlu1 %415  ;;  %v522_v44 = vld [vmem:[#allocation2 + $0x48] sm:$0xf] }
 0x119   : > { %v341_v45 = vsel %vm340_vm2, %v337_v34, %v339_v42  ;;  %v419_v46 = vsel %vm361_vm5, %v416_v43, %v418_v32  ;;  %679 = vmatprep.subr.msk.mxu0 %vm533_vm14, %v522_v44  ;;  %v521_v47 = vld [vmem:[#allocation2 + $0x40] sm:$0xf]  ;;  %vm313_vm2 = vcmask 1047684  }
 0x11a   : > { %346 = vst [vmem:[#allocation2 + $0x18] sm:$0xf] %v341_v45  ;;  %422 = vst [vmem:[#allocation2 + $0x20] sm:$0xf0] %v419_v46  ;;  %680 = vmatpush1.msk.msra.mxu0 %vm533_vm14, %v521_v47 }
 0x11c   : > { %v368_v48 = vpop.permute.xlu1 %367  ;;  %v277_v49 = vpop.permute.xlu0 %276  ;;  %v520_v50 = vld [vmem:[#allocation2 + $0x38] sm:$0xff] }
 0x11d   : > { %v372_v51 = vsel %vm371_vm3, %v368_v48, %v370_v33  ;;  %376 = vst.msk [vmem:[#allocation2 + $0x10] sm:$0xf0] %vm375_vm15, %v368_v48  ;;  %v279_v52 = vsel %vm278_vm1, %v275_v36, %v277_v49  ;;  %564 = vmatprep.subr.mxu0 %v520_v50  ;;  %v519_v53 = vld [vmem:[#allocation2 + $0x30] sm:$0xff]  ;;  %vm529_vm1 = vcmask 293888  }
 0x11e   : > { %377 = vst [vmem:[#allocation2 + $0x18] sm:$0xf0] %v372_v51  ;;  %284 = vst [vmem:[#allocation2 + $0x8] sm:$0xf] %v279_v52  ;;  %565 = vmatpush1.msra.mxu0 %v519_v53 }
 0x11f   : > { %566 = vmatprep.subr.mxu0 %v518_v54 }
 0x120   : > { %v306_v55 = vpop.permute.xlu1 %305  ;;  %v308_v56 = vpop.permute.xlu0 %307 }
 0x121   : > { %314 = vst.msk [vmem:[#allocation2] sm:$0xf0] %vm313_vm2, %v306_v55  ;;  %v310_v57 = vsel %vm309_vm0, %v306_v55, %v308_v56  ;;  %v517_v58 = vld [vmem:[#allocation2 + $0x20] sm:$0xff] }
 0x122   : > { %315 = vst [vmem:[#allocation2 + $0x8] sm:$0xf0] %v310_v57  ;;  %567 = vmatpush1.msra.mxu0 %v517_v58 }
 0x124   : > { %v515_v60 = vld [vmem:[#allocation2 + $0x10] sm:$0xff] }
 0x125   : > { %v516_v59 = vld [vmem:[#allocation2 + $0x18] sm:$0xff] }
 0x126   : > { %568 = vmatprep.subr.mxu0 %v516_v59 }
 0x127   : > { %569 = vmatpush1.msra.mxu0 %v515_v60 }
 0x128   : > { %v513_v63 = vld [vmem:[#allocation2] sm:$0xff] }
 0x129   : > { %v514_v61 = vld [vmem:[#allocation2 + $0x8] sm:$0xff] }
 0x12a   : > { %570 = vmatprep.subr.mxu0 %v514_v61 }
 0x12b   : > { %571 = vmatpush1.msra.mxu0 %v513_v63 }
 0x12c   : > { %681 = vmatmul.mubr.msk.f32.vlgmr.msra.gmra.mxu0 %vm529_vm1, %v512_v62 }
 0x12d   : > { %v527_v0 = vpop.permute.xlu1 %526 }
 0x1ec   : > { %v606_v1 = vpop.f32.mrf.mxu0 }
 0x1ed   : > { %v607_v2 = vadd.f32 %v606_v1, %v527_v0 }
 0x1ee   : > { %v608_v3 = vpop.f32.mrf.mxu0 }
 0x1ef   : > { %611 = vst [vmem:[%s224_s26] sm:$0xff] %v607_v2  ;;  %v609_v4 = vadd.f32 %v608_v3, %v527_v0 }
 0x1f1   : > { %612 = vst [vmem:[%s224_s26 + $0x8] sm:$0xff] %v609_v4 }
 0x1f2 PF: > { %s15_s18 = sadd.s32 1, %s713_s18  }
 0x1f3   : > { %p12_p4 = scmp.ge.s32.totalorder %s15_s18, 4  }
 0x1f5   :  { %14 = sbr.rel (!%p12_p4) target bundleno = 1 (0x1), region = 70 }

</bundles_post_ra>
